<compile_context>
chip_gen: v5e
topology: v5e:2x2
jax: 0.10.0
libtpu: 0.0.40
codegen_flags: <defaults>
</compile_context>

<pallas_src>
import numpy as np
import jax
import jax.numpy as jnp
from jax.experimental import pallas as pl
from jax.experimental.pallas import tpu as pltpu


def _resnetg_kernel(a_ref, x_ref, dis_ref, ready_ref,
                    w1_ref, b1_ref, w2h_ref, w2x_ref, b2_ref,
                    wvn_ref, bvn_ref, out_ref):
    n = a_ref.shape[0]
    out_w = out_ref.shape[-1]

    a_bf = a_ref[...]                       # [N,N] bf16 binary A_hat (self loops included)
    a_f32 = a_bf.astype(jnp.float32)
    x = x_ref[...]                          # [N,D] f32 node features (x_res)
    dis = dis_ref[...]                      # [N,1] f32, D^{-1/2}

    # --- conv_succ1: h = relu(A_norm @ (X @ W1^T) + b1),  A_norm = dis*A_hat*dis
    xw = jnp.dot(x, w1_ref[...], preferred_element_type=jnp.float32)        # [N,64] MXU
    agg = jnp.dot(a_bf, (xw * dis).astype(jnp.bfloat16),
                  preferred_element_type=jnp.float32)                        # [N,64] bf16 MXU
    h = jnp.maximum(dis * agg + b1_ref[...], 0.0)                            # [N,64]

    # --- conv_probs: p = A_norm @ (h @ w2h + x @ w2x) + b2   (no MXU: the
    #     1-column matmuls become VPU broadcast-multiplies + reduces)
    pw = (jnp.sum(h * w2h_ref[...], axis=-1, keepdims=True)
          + jnp.sum(x * w2x_ref[...], axis=-1, keepdims=True))               # [N,1]
    s = dis * pw                                                             # [N,1]
    # transpose [N,1] -> [1,N] via iota spread + sublane reduce (robust, XLU)
    lane_s = jax.lax.broadcasted_iota(jnp.int32, (n, n), 1)
    node_s = jax.lax.broadcasted_iota(jnp.int32, (n, n), 0)
    s_row = jnp.sum(jnp.where(lane_s == node_s, s, 0.0), axis=0, keepdims=True)  # [1,N]
    agg_p = jnp.sum(a_f32 * s_row, axis=-1, keepdims=True)                   # [N,1]
    p = dis * agg_p + b2_ref[...]                                            # [N,1]

    # --- value / do-nothing heads on mean-pooled h (stacked weights, VPU)
    x_mean = jnp.mean(h, axis=0, keepdims=True)                              # [1,64]
    vn = jnp.sum(x_mean * wvn_ref[...], axis=-1, keepdims=True) + bvn_ref[...]  # [2,1]
    v = vn[0:1, :]                                                           # [1,1]
    pn = vn[1:2, :]                                                          # [1,1]

    # --- masked softmax over [p[ready], prob_nothing]  (numerically stable,
    #     exponentiate the clamped logits)
    mask = ready_ref[...] > 0.5                                              # [N,1]
    lg = jnp.where(mask, p, jnp.float32(-1e30))
    m = jnp.maximum(jnp.max(lg), pn)                                         # [1,1]
    eg = jnp.where(mask, jnp.exp(lg - m), 0.0)                               # [N,1]
    en = jnp.exp(pn - m)                                                     # [1,1]
    inv = pl.reciprocal(jnp.sum(eg) + en, approx=True)                       # [1,1] EUP
    probs = eg * inv                                                         # [N,1]
    pnoth = en * inv                                                         # [1,1]

    # --- pack one lane-dense output row: [probs_0..probs_{N-1}, pnoth, v, 0...]
    lane2 = jax.lax.broadcasted_iota(jnp.int32, (n, out_w), 1)
    node2 = jax.lax.broadcasted_iota(jnp.int32, (n, out_w), 0)
    row = jnp.sum(jnp.where(lane2 == node2, probs, 0.0), axis=0, keepdims=True)  # [1,OUT]
    lane1 = jax.lax.broadcasted_iota(jnp.int32, (1, out_w), 1)
    row = row + jnp.where(lane1 == n, pnoth, 0.0) + jnp.where(lane1 == n + 1, v, 0.0)
    out_ref[...] = row


def init_params(key, input_dim=11):
    """Deterministic synthetic parameters matching ResNetG.__init__ shapes."""
    ks = jax.random.split(key, 8)
    rnd = lambda k, shape, s=0.2: jax.random.normal(k, shape, jnp.float32) * s
    return dict(
        w_succ1=rnd(ks[0], (64, input_dim)),          # GCNConv(in, 64).lin.weight
        b_succ1=rnd(ks[1], (64,)),                    # GCNConv(in, 64).bias
        w_probs=rnd(ks[2], (1, 64 + input_dim)),      # GCNConv(75, 1).lin.weight
        b_probs=rnd(ks[3], (1,)),                     # GCNConv(75, 1).bias
        w_nothing=rnd(ks[4], (1, 64)),                # Linear(64, 1).weight
        b_nothing=rnd(ks[5], (1,)),
        w_value=rnd(ks[6], (1, 64)),                  # Linear(64, 1).weight
        b_value=rnd(ks[7], (1,)),
    )


def build_adjacency(edge_index, num_nodes):
    """edge_index: [B, 2, E] int -> binary adjacency [B, N, N] (no self loops)."""
    def one(ei):
        a = jnp.zeros((num_nodes, num_nodes), jnp.float32)
        return a.at[ei[0], ei[1]].set(1.0)
    return jax.vmap(one)(edge_index)


def resnetg_forward(params, x, adj, ready):
    """Jittable batched ResNetG forward.

    x:     [B, N, D] float32 node features
    adj:   [B, N, N] {0,1} float32 (row = source, col = target; no self loops)
    ready: [B, N, 1] int mask of selectable nodes

    Returns (probs_dense [B,N], prob_nothing [B], value [B]).  probs_dense has
    zeros at non-ready nodes; together with prob_nothing it sums to 1 per
    graph (same masked softmax as torch's softmax over cat(probs[ready], pn)).
    """
    B, N, D = x.shape
    OUT = ((N + 2 + 127) // 128) * 128        # lane-dense, 128-padded output row

    # GCN normalization glue (flow='target_to_source' convention kept from the
    # previous version: deg = row sums of A_hat, symmetric D^{-1/2} A D^{-1/2}).
    a_hat = jnp.maximum(adj, jnp.eye(N, dtype=jnp.float32)[None])   # add self loops
    deg = jnp.sum(a_hat, axis=-1, keepdims=True)                    # [B,N,1]
    dis = jnp.where(deg > 0, jax.lax.rsqrt(deg), 0.0)               # [B,N,1]
    a_bf = a_hat.astype(jnp.bfloat16)                               # binary -> exact in bf16
    ready_f = ready.astype(jnp.float32)

    # Parameter layout for the kernel (all 2-D, shared across the batch).
    w1 = params["w_succ1"].T                   # [D,64]
    b1 = params["b_succ1"][None, :]            # [1,64]
    w2h = params["w_probs"][:, :64]            # [1,64]
    w2x = params["w_probs"][:, 64:]            # [1,D]
    b2 = params["b_probs"][None, :]            # [1,1]
    wvn = jnp.concatenate([params["w_value"], params["w_nothing"]], axis=0)   # [2,64]
    bvn = jnp.stack([params["b_value"][0], params["b_nothing"][0]])[:, None]  # [2,1]

    spec_g = lambda s: pl.BlockSpec((None,) + s, lambda b: (b, 0, 0))   # per-graph block
    spec_w = lambda s: pl.BlockSpec(s, lambda b: (0, 0))                # shared weights

    packed = pl.pallas_call(
        _resnetg_kernel,
        out_shape=jax.ShapeDtypeStruct((B, 1, OUT), jnp.float32),
        grid_spec=pltpu.PrefetchScalarGridSpec(
            num_scalar_prefetch=0,
            grid=(B,),
            in_specs=[
                spec_g((N, N)),     # a_bf
                spec_g((N, D)),     # x
                spec_g((N, 1)),     # dis
                spec_g((N, 1)),     # ready
                spec_w((D, 64)),    # w1
                spec_w((1, 64)),    # b1
                spec_w((1, 64)),    # w2h
                spec_w((1, D)),     # w2x
                spec_w((1, 1)),     # b2
                spec_w((2, 64)),    # wvn
                spec_w((2, 1)),     # bvn
            ],
            out_specs=pl.BlockSpec((None, 1, OUT), lambda b: (b, 0, 0)),
        ),
        compiler_params=pltpu.CompilerParams(
            dimension_semantics=("parallel",)),   # megacore sharding on v7x
    )(a_bf, x, dis, ready_f, w1, b1, w2h, w2x, b2, wvn, bvn)

    packed = packed[:, 0, :]
    return packed[:, :N], packed[:, N], packed[:, N + 1]


if __name__ == "__main__":
    key = jax.random.PRNGKey(0)
    kp, kx = jax.random.split(key)

    input_dim = 11   # required: conv_probs in_channels = 75 = 64 + input_dim
    N = 8            # nodes per graph
    B = 4            # graphs batched into one pallas_call

    params = init_params(kp, input_dim)
    x = jax.random.normal(kx, (B, N, input_dim), jnp.float32)

    # small DAG, reused for every graph in the batch (row = source, col = target)
    ei = jnp.array([[0, 0, 1, 2, 3, 4, 5, 6],
                    [1, 2, 3, 4, 5, 6, 7, 7]], dtype=jnp.int32)
    edge_index = jnp.broadcast_to(ei[None], (B, 2, ei.shape[1]))
    adj = build_adjacency(edge_index, N)

    ready = jnp.broadcast_to(
        jnp.array([[1], [1], [0], [1], [0], [0], [1], [0]], jnp.int32)[None],
        (B, N, 1))

    fwd = jax.jit(resnetg_forward)
    probs_dense, pnoth, v = fwd(params, x, adj, ready)
    jax.block_until_ready((probs_dense, pnoth, v))

    # sanity: masked softmax sums to 1 per graph
    total = np.asarray(jnp.sum(probs_dense, axis=-1) + pnoth)
    assert np.allclose(total, 1.0, atol=1e-2), total

    # TODO(synk): the torch module returns a variable-length vector
    # cat(probs[ready], prob_nothing); that data-dependent gather has no fixed
    # output shape, so it stays as host/XLA glue outside the jitted path.
    ready0 = np.asarray(ready[0, :, 0]).astype(bool)
    probs_graph0 = np.concatenate(
        [np.asarray(probs_dense[0])[ready0], np.asarray(pnoth[0:1])])
    value_graph0 = np.asarray(v[0:1])
    _ = probs_graph0, value_graph0

    print("KERNEL_OK")
</pallas_src>

<mosaic_0001>
module attributes {stable_mosaic.version = 11 : i64} {
  func.func @_resnetg_kernel(%arg0: i32, %arg1: memref<1x8x8xbf16, #tpu.memory_space<vmem>>, %arg2: memref<1x8x11xf32, #tpu.memory_space<vmem>>, %arg3: memref<1x8x1xf32, #tpu.memory_space<vmem>>, %arg4: memref<1x8x1xf32, #tpu.memory_space<vmem>>, %arg5: memref<11x64xf32, #tpu.memory_space<vmem>>, %arg6: memref<1x64xf32, #tpu.memory_space<vmem>>, %arg7: memref<1x64xf32, #tpu.memory_space<vmem>>, %arg8: memref<1x11xf32, #tpu.memory_space<vmem>>, %arg9: memref<1x1xf32, #tpu.memory_space<vmem>>, %arg10: memref<2x64xf32, #tpu.memory_space<vmem>>, %arg11: memref<2x1xf32, #tpu.memory_space<vmem>>, %arg12: memref<1x1x128xf32, #tpu.memory_space<vmem>>) attributes {dimension_semantics = [#tpu.dimension_semantics<parallel>], iteration_bounds = array<i64: 4>, scalar_prefetch = 0 : i64, scratch_operands = 0 : i64, tpu.core_type = #tpu.core_type<tc>, window_params = [{transform_indices = @transform_0, window_bounds = array<i64: 1, 8, 8>}, {transform_indices = @transform_1, window_bounds = array<i64: 1, 8, 11>}, {transform_indices = @transform_2, window_bounds = array<i64: 1, 8, 1>}, {transform_indices = @transform_3, window_bounds = array<i64: 1, 8, 1>}, {pipeline_mode = #tpu.pipeline_mode<synchronous>, transform_indices = @transform_4, window_bounds = array<i64: 11, 64>}, {pipeline_mode = #tpu.pipeline_mode<synchronous>, transform_indices = @transform_5, window_bounds = array<i64: 1, 64>}, {pipeline_mode = #tpu.pipeline_mode<synchronous>, transform_indices = @transform_6, window_bounds = array<i64: 1, 64>}, {pipeline_mode = #tpu.pipeline_mode<synchronous>, transform_indices = @transform_7, window_bounds = array<i64: 1, 11>}, {pipeline_mode = #tpu.pipeline_mode<synchronous>, transform_indices = @transform_8, window_bounds = array<i64: 1, 1>}, {pipeline_mode = #tpu.pipeline_mode<synchronous>, transform_indices = @transform_9, window_bounds = array<i64: 2, 64>}, {pipeline_mode = #tpu.pipeline_mode<synchronous>, transform_indices = @transform_10, window_bounds = array<i64: 2, 1>}, {transform_indices = @transform_11, window_bounds = array<i64: 1, 1, 128>}]} {
    %c0 = arith.constant 0 : index
    %c0_0 = arith.constant 0 : index
    %c0_1 = arith.constant 0 : index
    %0 = vector.load %arg1[%c0, %c0_0, %c0_1] : memref<1x8x8xbf16, #tpu.memory_space<vmem>>, vector<1x8x8xbf16>
    %1 = vector.shape_cast %0 : vector<1x8x8xbf16> to vector<8x8xbf16>
    %2 = arith.extf %1 : vector<8x8xbf16> to vector<8x8xf32>
    %c0_2 = arith.constant 0 : index
    %c0_3 = arith.constant 0 : index
    %c0_4 = arith.constant 0 : index
    %3 = vector.load %arg2[%c0_2, %c0_3, %c0_4] : memref<1x8x11xf32, #tpu.memory_space<vmem>>, vector<1x8x11xf32>
    %4 = vector.shape_cast %3 : vector<1x8x11xf32> to vector<8x11xf32>
    %c0_5 = arith.constant 0 : index
    %c0_6 = arith.constant 0 : index
    %c0_7 = arith.constant 0 : index
    %5 = vector.load %arg3[%c0_5, %c0_6, %c0_7] : memref<1x8x1xf32, #tpu.memory_space<vmem>>, vector<1x8x1xf32>
    %6 = vector.shape_cast %5 : vector<1x8x1xf32> to vector<8x1xf32>
    %c0_8 = arith.constant 0 : index
    %c0_9 = arith.constant 0 : index
    %7 = vector.load %arg5[%c0_8, %c0_9] : memref<11x64xf32, #tpu.memory_space<vmem>>, vector<11x64xf32>
    %cst = arith.constant dense<0.000000e+00> : vector<8x64xf32>
    %8 = tpu.matmul %4, %7, %cst {dimension_numbers = #tpu.dot_dimension_numbers<[1], [0], [0], [1], [0, 0, 1, 1], [], []>} : vector<8x11xf32>, vector<11x64xf32>, vector<8x64xf32> -> vector<8x64xf32>
    %9 = vector.broadcast %6 : vector<8x1xf32> to vector<8x64xf32>
    %10 = arith.mulf %8, %9 : vector<8x64xf32>
    %11 = arith.truncf %10 : vector<8x64xf32> to vector<8x64xbf16>
    %cst_10 = arith.constant dense<0.000000e+00> : vector<8x64xf32>
    %12 = tpu.matmul %1, %11, %cst_10 {dimension_numbers = #tpu.dot_dimension_numbers<[1], [0], [0], [1], [0, 0, 1, 1], [], []>} : vector<8x8xbf16>, vector<8x64xbf16>, vector<8x64xf32> -> vector<8x64xf32>
    %13 = vector.broadcast %6 : vector<8x1xf32> to vector<8x64xf32>
    %14 = arith.mulf %13, %12 : vector<8x64xf32>
    %c0_11 = arith.constant 0 : index
    %c0_12 = arith.constant 0 : index
    %15 = vector.load %arg6[%c0_11, %c0_12] : memref<1x64xf32, #tpu.memory_space<vmem>>, vector<1x64xf32>
    %16 = vector.broadcast %15 : vector<1x64xf32> to vector<8x64xf32>
    %17 = arith.addf %14, %16 : vector<8x64xf32>
    %cst_13 = arith.constant 0.000000e+00 : f32
    %18 = vector.broadcast %cst_13 : f32 to vector<8x64xf32>
    %19 = arith.maximumf %17, %18 : vector<8x64xf32>
    %c0_14 = arith.constant 0 : index
    %c0_15 = arith.constant 0 : index
    %20 = vector.load %arg7[%c0_14, %c0_15] : memref<1x64xf32, #tpu.memory_space<vmem>>, vector<1x64xf32>
    %21 = vector.broadcast %20 : vector<1x64xf32> to vector<8x64xf32>
    %22 = arith.mulf %19, %21 : vector<8x64xf32>
    %cst_16 = arith.constant dense<0.000000e+00> : vector<8xf32>
    %23 = vector.multi_reduction <add>, %22, %cst_16 [1] : vector<8x64xf32> to vector<8xf32>
    %24 = vector.shape_cast %23 : vector<8xf32> to vector<8x1xf32>
    %c0_17 = arith.constant 0 : index
    %c0_18 = arith.constant 0 : index
    %25 = vector.load %arg8[%c0_17, %c0_18] : memref<1x11xf32, #tpu.memory_space<vmem>>, vector<1x11xf32>
    %26 = vector.broadcast %25 : vector<1x11xf32> to vector<8x11xf32>
    %27 = arith.mulf %4, %26 : vector<8x11xf32>
    %cst_19 = arith.constant dense<0.000000e+00> : vector<8xf32>
    %28 = vector.multi_reduction <add>, %27, %cst_19 [1] : vector<8x11xf32> to vector<8xf32>
    %29 = vector.shape_cast %28 : vector<8xf32> to vector<8x1xf32>
    %30 = arith.addf %24, %29 : vector<8x1xf32>
    %31 = arith.mulf %6, %30 : vector<8x1xf32>
    %32 = tpu.iota {dimensions = array<i32: 1>} : vector<8x8xi32>
    %33 = tpu.iota {dimensions = array<i32: 0>} : vector<8x8xi32>
    %34 = arith.cmpi eq, %32, %33 : vector<8x8xi32>
    %cst_20 = arith.constant 0.000000e+00 : f32
    %35 = vector.shape_cast %31 : vector<8x1xf32> to vector<8x1xf32>
    %36 = vector.broadcast %35 : vector<8x1xf32> to vector<8x8xf32>
    %37 = vector.broadcast %cst_20 : f32 to vector<8x8xf32>
    %38 = arith.select %34, %36, %37 : vector<8x8xi1>, vector<8x8xf32>
    %cst_21 = arith.constant dense<0.000000e+00> : vector<8xf32>
    %39 = vector.multi_reduction <add>, %38, %cst_21 [0] : vector<8x8xf32> to vector<8xf32>
    %40 = vector.shape_cast %39 : vector<8xf32> to vector<1x8xf32>
    %41 = vector.broadcast %40 : vector<1x8xf32> to vector<8x8xf32>
    %42 = arith.mulf %2, %41 : vector<8x8xf32>
    %cst_22 = arith.constant dense<0.000000e+00> : vector<8xf32>
    %43 = vector.multi_reduction <add>, %42, %cst_22 [1] : vector<8x8xf32> to vector<8xf32>
    %44 = vector.shape_cast %43 : vector<8xf32> to vector<8x1xf32>
    %45 = arith.mulf %6, %44 : vector<8x1xf32>
    %c0_23 = arith.constant 0 : index
    %c0_24 = arith.constant 0 : index
    %46 = vector.load %arg9[%c0_23, %c0_24] : memref<1x1xf32, #tpu.memory_space<vmem>>, vector<1x1xf32>
    %47 = vector.broadcast %46 : vector<1x1xf32> to vector<8x1xf32>
    %48 = arith.addf %45, %47 : vector<8x1xf32>
    %cst_25 = arith.constant dense<0.000000e+00> : vector<64xf32>
    %49 = vector.multi_reduction <add>, %19, %cst_25 [0] : vector<8x64xf32> to vector<64xf32>
    %50 = vector.shape_cast %49 : vector<64xf32> to vector<1x64xf32>
    %cst_26 = arith.constant 8.000000e+00 : f32
    %51 = vector.broadcast %cst_26 : f32 to vector<1x64xf32>
    %52 = arith.divf %50, %51 : vector<1x64xf32>
    %c0_27 = arith.constant 0 : index
    %c0_28 = arith.constant 0 : index
    %53 = vector.load %arg10[%c0_27, %c0_28] : memref<2x64xf32, #tpu.memory_space<vmem>>, vector<2x64xf32>
    %54 = vector.broadcast %52 : vector<1x64xf32> to vector<2x64xf32>
    %55 = arith.mulf %54, %53 : vector<2x64xf32>
    %cst_29 = arith.constant dense<0.000000e+00> : vector<2xf32>
    %56 = vector.multi_reduction <add>, %55, %cst_29 [1] : vector<2x64xf32> to vector<2xf32>
    %57 = vector.shape_cast %56 : vector<2xf32> to vector<2x1xf32>
    %c0_30 = arith.constant 0 : index
    %c0_31 = arith.constant 0 : index
    %58 = vector.load %arg11[%c0_30, %c0_31] : memref<2x1xf32, #tpu.memory_space<vmem>>, vector<2x1xf32>
    %59 = arith.addf %57, %58 : vector<2x1xf32>
    %60 = vector.extract_strided_slice %59 {offsets = [0, 0], sizes = [1, 1], strides = [1, 1]} : vector<2x1xf32> to vector<1x1xf32>
    %61 = vector.extract_strided_slice %59 {offsets = [1, 0], sizes = [1, 1], strides = [1, 1]} : vector<2x1xf32> to vector<1x1xf32>
    %c0_32 = arith.constant 0 : index
    %c0_33 = arith.constant 0 : index
    %c0_34 = arith.constant 0 : index
    %62 = vector.load %arg4[%c0_32, %c0_33, %c0_34] : memref<1x8x1xf32, #tpu.memory_space<vmem>>, vector<1x8x1xf32>
    %63 = vector.shape_cast %62 : vector<1x8x1xf32> to vector<8x1xf32>
    %cst_35 = arith.constant 5.000000e-01 : f32
    %64 = vector.broadcast %cst_35 : f32 to vector<8x1xf32>
    %65 = arith.cmpf ogt, %63, %64 : vector<8x1xf32>
    %cst_36 = arith.constant -1.000000e+30 : f32
    %66 = vector.broadcast %cst_36 : f32 to vector<8x1xf32>
    %67 = arith.select %65, %48, %66 : vector<8x1xi1>, vector<8x1xf32>
    %68 = vector.shape_cast %67 : vector<8x1xf32> to vector<1x8x1xf32>
    %cst_37 = arith.constant dense<0xFF800000> : vector<1xf32>
    %69 = vector.multi_reduction <maximumf>, %68, %cst_37 [1, 2] : vector<1x8x1xf32> to vector<1xf32>
    %70 = vector.shape_cast %69 : vector<1xf32> to vector<1x1x1xf32>
    %71 = vector.extract %70[0, 0, 0] : f32 from vector<1x1x1xf32>
    %72 = vector.broadcast %71 : f32 to vector<1x1xf32>
    %73 = arith.maximumf %72, %61 : vector<1x1xf32>
    %74 = vector.broadcast %73 : vector<1x1xf32> to vector<8x1xf32>
    %75 = arith.subf %67, %74 : vector<8x1xf32>
    %76 = math.exp %75 : vector<8x1xf32>
    %cst_38 = arith.constant 0.000000e+00 : f32
    %77 = vector.broadcast %cst_38 : f32 to vector<8x1xf32>
    %78 = arith.select %65, %76, %77 : vector<8x1xi1>, vector<8x1xf32>
    %79 = arith.subf %61, %73 : vector<1x1xf32>
    %80 = math.exp %79 : vector<1x1xf32>
    %81 = vector.shape_cast %78 : vector<8x1xf32> to vector<1x8x1xf32>
    %cst_39 = arith.constant dense<0.000000e+00> : vector<1xf32>
    %82 = vector.multi_reduction <add>, %81, %cst_39 [1, 2] : vector<1x8x1xf32> to vector<1xf32>
    %83 = vector.shape_cast %82 : vector<1xf32> to vector<1x1x1xf32>
    %84 = vector.extract %83[0, 0, 0] : f32 from vector<1x1x1xf32>
    %85 = vector.broadcast %84 : f32 to vector<1x1xf32>
    %86 = arith.addf %85, %80 : vector<1x1xf32>
    %87 = tpu.reciprocal %86 {approx = true} : vector<1x1xf32> -> vector<1x1xf32>
    %88 = vector.broadcast %87 : vector<1x1xf32> to vector<8x1xf32>
    %89 = arith.mulf %78, %88 : vector<8x1xf32>
    %90 = arith.mulf %80, %87 : vector<1x1xf32>
    %91 = tpu.iota {dimensions = array<i32: 1>} : vector<8x128xi32>
    %92 = tpu.iota {dimensions = array<i32: 0>} : vector<8x128xi32>
    %93 = arith.cmpi eq, %91, %92 : vector<8x128xi32>
    %cst_40 = arith.constant 0.000000e+00 : f32
    %94 = vector.shape_cast %89 : vector<8x1xf32> to vector<8x1xf32>
    %95 = vector.broadcast %94 : vector<8x1xf32> to vector<8x128xf32>
    %96 = vector.broadcast %cst_40 : f32 to vector<8x128xf32>
    %97 = arith.select %93, %95, %96 : vector<8x128xi1>, vector<8x128xf32>
    %cst_41 = arith.constant dense<0.000000e+00> : vector<128xf32>
    %98 = vector.multi_reduction <add>, %97, %cst_41 [0] : vector<8x128xf32> to vector<128xf32>
    %99 = vector.shape_cast %98 : vector<128xf32> to vector<1x128xf32>
    %100 = tpu.iota {dimensions = array<i32: 1>} : vector<1x128xi32>
    %c8_i32 = arith.constant 8 : i32
    %101 = vector.broadcast %c8_i32 : i32 to vector<1x128xi32>
    %102 = arith.cmpi eq, %100, %101 : vector<1x128xi32>
    %cst_42 = arith.constant 0.000000e+00 : f32
    %103 = vector.shape_cast %90 : vector<1x1xf32> to vector<1x1xf32>
    %104 = vector.broadcast %103 : vector<1x1xf32> to vector<1x128xf32>
    %105 = vector.broadcast %cst_42 : f32 to vector<1x128xf32>
    %106 = arith.select %102, %104, %105 : vector<1x128xi1>, vector<1x128xf32>
    %107 = arith.addf %99, %106 : vector<1x128xf32>
    %c9_i32 = arith.constant 9 : i32
    %108 = vector.broadcast %c9_i32 : i32 to vector<1x128xi32>
    %109 = arith.cmpi eq, %100, %108 : vector<1x128xi32>
    %cst_43 = arith.constant 0.000000e+00 : f32
    %110 = vector.shape_cast %60 : vector<1x1xf32> to vector<1x1xf32>
    %111 = vector.broadcast %110 : vector<1x1xf32> to vector<1x128xf32>
    %112 = vector.broadcast %cst_43 : f32 to vector<1x128xf32>
    %113 = arith.select %109, %111, %112 : vector<1x128xi1>, vector<1x128xf32>
    %114 = arith.addf %107, %113 : vector<1x128xf32>
    %c0_44 = arith.constant 0 : index
    %c0_45 = arith.constant 0 : index
    %c0_46 = arith.constant 0 : index
    %115 = vector.load %arg12[%c0_44, %c0_45, %c0_46] : memref<1x1x128xf32, #tpu.memory_space<vmem>>, vector<1x1x128xf32>
    %116 = vector.shape_cast %115 : vector<1x1x128xf32> to vector<1x128xf32>
    %117 = vector.shape_cast %114 : vector<1x128xf32> to vector<1x1x128xf32>
    tpu.vector_store %arg12[%c0_44, %c0_45, %c0_46], %117 {strides = array<i32>} : memref<1x1x128xf32, #tpu.memory_space<vmem>>, vector<1x1x128xf32>,
    return
  }
  func.func @transform_0(%arg0: i32) -> (i32, i32, i32) {
    %c0_i32 = arith.constant 0 : i32
    %c0_i32_0 = arith.constant 0 : i32
    %c0_i32_1 = arith.constant 0 : i32
    return %arg0, %c0_i32, %c0_i32_0 : i32, i32, i32
  }
  func.func @transform_1(%arg0: i32) -> (i32, i32, i32) {
    %c0_i32 = arith.constant 0 : i32
    %c0_i32_0 = arith.constant 0 : i32
    %c0_i32_1 = arith.constant 0 : i32
    return %arg0, %c0_i32, %c0_i32_0 : i32, i32, i32
  }
  func.func @transform_2(%arg0: i32) -> (i32, i32, i32) {
    %c0_i32 = arith.constant 0 : i32
    %c0_i32_0 = arith.constant 0 : i32
    %c0_i32_1 = arith.constant 0 : i32
    return %arg0, %c0_i32, %c0_i32_0 : i32, i32, i32
  }
  func.func @transform_3(%arg0: i32) -> (i32, i32, i32) {
    %c0_i32 = arith.constant 0 : i32
    %c0_i32_0 = arith.constant 0 : i32
    %c0_i32_1 = arith.constant 0 : i32
    return %arg0, %c0_i32, %c0_i32_0 : i32, i32, i32
  }
  func.func @transform_4(%arg0: i32) -> (i32, i32) {
    %c0_i32 = arith.constant 0 : i32
    %c0_i32_0 = arith.constant 0 : i32
    %c0_i32_1 = arith.constant 0 : i32
    return %c0_i32, %c0_i32_0 : i32, i32
  }
  func.func @transform_5(%arg0: i32) -> (i32, i32) {
    %c0_i32 = arith.constant 0 : i32
    %c0_i32_0 = arith.constant 0 : i32
    %c0_i32_1 = arith.constant 0 : i32
    return %c0_i32, %c0_i32_0 : i32, i32
  }
  func.func @transform_6(%arg0: i32) -> (i32, i32) {
    %c0_i32 = arith.constant 0 : i32
    %c0_i32_0 = arith.constant 0 : i32
    %c0_i32_1 = arith.constant 0 : i32
    return %c0_i32, %c0_i32_0 : i32, i32
  }
  func.func @transform_7(%arg0: i32) -> (i32, i32) {
    %c0_i32 = arith.constant 0 : i32
    %c0_i32_0 = arith.constant 0 : i32
    %c0_i32_1 = arith.constant 0 : i32
    return %c0_i32, %c0_i32_0 : i32, i32
  }
  func.func @transform_8(%arg0: i32) -> (i32, i32) {
    %c0_i32 = arith.constant 0 : i32
    %c0_i32_0 = arith.constant 0 : i32
    %c0_i32_1 = arith.constant 0 : i32
    return %c0_i32, %c0_i32_0 : i32, i32
  }
  func.func @transform_9(%arg0: i32) -> (i32, i32) {
    %c0_i32 = arith.constant 0 : i32
    %c0_i32_0 = arith.constant 0 : i32
    %c0_i32_1 = arith.constant 0 : i32
    return %c0_i32, %c0_i32_0 : i32, i32
  }
  func.func @transform_10(%arg0: i32) -> (i32, i32) {
    %c0_i32 = arith.constant 0 : i32
    %c0_i32_0 = arith.constant 0 : i32
    %c0_i32_1 = arith.constant 0 : i32
    return %c0_i32, %c0_i32_0 : i32, i32
  }
  func.func @transform_11(%arg0: i32) -> (i32, i32, i32) {
    %c0_i32 = arith.constant 0 : i32
    %c0_i32_0 = arith.constant 0 : i32
    %c0_i32_1 = arith.constant 0 : i32
    return %arg0, %c0_i32, %c0_i32_0 : i32, i32, i32
  }
}

</mosaic_0001>

<bundles_post_ra>
// kernel: resnetg_forward.1
= control target key start
LH: loop header
LB: loop body
LE: loop exit
PB: predicated region body
PF: predicated region fallthrough
CT: control target
= control target key end

     0   :  { %s844_s19 = smov 0   ;;  %s929_s0 = inlined_call_operand.vmem [shape: bf16[4,8,8], index: 0, kind: input, shape index: {}]   ;;  %s930_s1 = inlined_call_operand.vmem [shape: f32[4,8,11], index: 1, kind: input, shape index: {}]   ;;  %s931_s2 = inlined_call_operand.vmem [shape: f32[4,8,1], index: 2, kind: input, shape index: {}]   ;;  %s932_s3 = inlined_call_operand.vmem [shape: f32[4,8,1], index: 3, kind: input, shape index: {}]   ;;  %s933_s4 = inlined_call_operand.vmem [shape: f32[11,64], index: 4, kind: input, shape index: {}]   ;;  %s934_s5 = inlined_call_operand.vmem [shape: f32[1,64], index: 5, kind: input, shape index: {}]   ;;  %s935_s6 = inlined_call_operand.vmem [shape: f32[1,64], index: 6, kind: input, shape index: {}]   ;;  %s936_s7 = inlined_call_operand.vmem [shape: f32[1,11], index: 7, kind: input, shape index: {}]   ;;  %s937_s8 = inlined_call_operand.<no memory space> [shape: f32[1,1], index: 8, kind: input, shape index: {}]   ;;  %s938_s9 = inlined_call_operand.vmem [shape: f32[2,64], index: 9, kind: input, shape index: {}]   ;;  %s939_s10 = inlined_call_operand.vmem [shape: f32[2,1], index: 10, kind: input, shape index: {}]   ;;  %s940_s11 = inlined_call_operand.vmem [shape: f32[4,1,128], index: 11, kind: output, shape index: {}]  }
   0x1   :  { %v16_v0 = vstv %s937_s8 }
   0x2   :  { %17 = vst [vmem:[#allocation2] sm:$0x1] %v16_v0 }
   0x3 LB: > { %s728_s20 = sadd.s32 4294967295, %s777_s19   ;;  %p732_p0 = scmp.ge.s32.totalorder %s777_s19, 1  ;;  %s777_s19 = sphi %s844_s19, %s23_s19  }
   0x4   : > { %p365_p1 = scmp.lt.s32.totalorder %s777_s19, 5 }
   0x6   : > { %p366_p2 = pnand %p732_p0, %p365_p1 }
   0x7   : > { %p414_p3 = scmp.lt.s32.totalorder (!%p366_p2), %s728_s20, 3 }
   0x8   : > { %369 = sbr.rel (%p366_p2) target bundleno = 1175 (0x497), region = 64 }
   0xd   : > { %v439_v1 = vld [vmem:[%s933_s4 + $0x8] sm:$0x7]  ;;  %vm444_vm0 = vcmask 1042432   ;;  %v438_v2 = vld [vmem:[%s933_s4] sm:$0xff]  ;;  %s942_s20 = smov (!%p414_p3, %s728_s20), 3  ;;  %v779_v3 = vmov 0   ;;  %v522_v29 = vlaneseq }
   0xe   : > { %737 = vmatpush.msk.msra.mxu0 %vm444_vm0, %v439_v1  ;;  %756 = vset.pattern.permute.xlu0 %v779_v3  ;;  %s861_s24 = sshll.u32 %s942_s20, 3  ;;  %vm440_vm1 = vcmask 89088   ;;  %s733_s12 = sshll.u32 %s942_s20, 2  ;;  %vm479_vm2 = vcmask 1043456   ;;  %vm475_vm3 = vcmask 64512   ;;  %vm508_vm4 = vcmask 523264  }
   0xf   : > { %757 = vset.pattern.permute.xlu1 %v779_v3  ;;  %758 = vset.pattern.permute.xlu2 %v779_v3  ;;  %s421_s27 = scalar_lea.vmem %s930_s1, %s861_s24  ;;  %s425_s30 = scalar_lea.vmem %s931_s2, %s861_s24  ;;  %v760_v12 = vld [vmem:[%s936_s7] ss:$0 sm:$0xff]  ;;  %v891_v30 = vand.u32 127, %v522_v29  ;;  %v893_v31 = vshrl.u32 %v522_v29, 7  ;;  %v780_v44 = vmov 8.0   ;;  %vm576_vm8 = vcmask 7168  }
  0x10   : > { %463 = vmatpush.msra.mxu0 %v438_v2  ;;  %v436_v4 = vld [vmem:[%s421_s27] sm:$0xff]  ;;  %s417_s15 = scalar_lea.vmem %s929_s0, %s733_s12  ;;  %763 = vrcp.f32 %v780_v44  ;;  %s429_s26 = scalar_lea.vmem %s932_s3, %s861_s24  ;;  %vm567_vm9 = vcmask 517120  }
  0x11   : > { %v871_v5 = vld [vmem:[%s425_s30] sm:$0xff]  ;;  %738 = vmatmul.msk.f32.vlgmr.msra.gmra.mxu0 %vm440_vm1, %v436_v4  ;;  %v516_v13 = vmul.f32 %v760_v12, %v436_v4  ;;  %vm526_vm5 = vcmp.eq.s32.totalorder %v891_v30, %v893_v31  ;;  %vm625_vm10 = vcmp.eq.s32.totalorder %v891_v30, 8  ;;  %vm633_vm11 = vcmp.eq.s32.totalorder %v891_v30, 9 }
  0x12   : > { %470 = vperm.xlu0 %756, %v871_v5   ;;  %v434_v11 = vld [vmem:[%s417_s15] sm:$0xf]  ;;  %s432_s15 = scalar_lea.vmem %s940_s11, %s942_s20 }
  0x13   : > { %v517_v14 = vsel %vm440_vm1, %v516_v13, 0.0  ;;  %v759_v15 = vld [vmem:[%s934_s5] ss:$0 sm:$0xff]  ;;  %v435_v39 = vunpack.c.l.bf16 %v434_v11 }
  0x14   : > { %518 = vadd.xlane.f32.xlu1 %v517_v14  ;;  %v761_v19 = vld [vmem:[%s935_s6] ss:$0 sm:$0xff] }
  0x15   : > { %v762_v54 = vld [vmem:[#allocation2] ss:$0 sm:$0xff] }
  0x16   : > { %v764_v46 = vpop.eup %763  ;;  %v573_v55 = vld [vmem:[%s429_s26] sm:$0xff] }
  0x17   : > { %v558_v48 = vmul.f32 8.0, %v764_v46  ;;  %vm562_vm6 = vweird.f32 %v764_v46  ;;  %vm574_vm7 = vcmp.gt.f32.partialorder %v573_v55, 0.5  ;;  %v565_v1 = vld [vmem:[%s938_s9] sm:$0x3] }
  0x19   : > { %v559_v50 = vsub.f32 1.0, %v558_v48 }
  0x1b   : > { %v560_v52 = vmul.f32 %v764_v46, %v559_v50 }
  0x1d   : > { %v561_v56 = vadd.f32 %v764_v46, %v560_v52 }
  0x1f   : > { %v563_v61 = vsel %vm562_vm6, %v764_v46, %v561_v56 }
  0x84   : > { %v471_v6 = vpop.permute.xlu0 %470 }
  0x87   : > { %v519_v25 = vpop.xlane.xlu1 %518 }
  0x8e   : > { %v465_v7 = vpop.f32.mrf.mxu0 }
  0x8f   : > { %v473_v8 = vmul.f32 %v471_v6, %v465_v7 }
  0x91   : > { %v474_v9 = vpack.c.bf16 %v473_v8, %v473_v8 }
  0x93   : > { %v481_v10 = vsel %vm479_vm2, %v474_v9, 0 }
  0x94   : > { %490 = vmatpush.bf16.msra.mxu1 %v481_v10 }
  0x97   : > { %739 = vmatmul.msk.bf16.vlgmr.msra.gmra.mxu1 %vm475_vm3, %v434_v11  ;;  %v571_v11 = vld [vmem:[%s939_s10] sm:$0x3] }
 0x114   : > { %v492_v16 = vpop.f32.mrf.mxu1 }
 0x115   : > { %v496_v17 = vmul.f32 %v492_v16, %v471_v6 }
 0x117   : > { %v501_v18 = vadd.f32 %v759_v15, %v496_v17 }
 0x119   : > { %v502_v20 = vmax.f32 %v501_v18, 0.0 }
 0x11b   : > { %v507_v21 = vmul.f32 %v761_v19, %v502_v20  ;;  %v550_v22 = vsel %vm508_vm4, %v502_v20, 0.0 }
 0x11c   : > { %v494_v23 = vpop.f32.mrf.mxu1  ;;  %v551_v45 = vrot.slane %v550_v22, 4 }
 0x11d   : > { %v509_v24 = vsel %vm508_vm4, %v507_v21, 0.0 }
 0x11e   : > { %510 = vadd.xlane.f32.xlu0 %v509_v24  ;;  %v552_v47 = vadd.f32 %v551_v45, %v550_v22 }
 0x120   : > { %v553_v49 = vrot.slane %v552_v47, 2 }
 0x122   : > { %v554_v51 = vadd.f32 %v553_v49, %v552_v47 }
 0x124   : > { %v555_v53 = vrot.slane %v554_v51, 1 }
 0x126   : > { %v556_v59 = vadd.f32 %v555_v53, %v554_v51 }
 0x128   : > { %v564_v0 = vmul.f32 %v563_v61, %v556_v59 }
 0x12a   : > { %v566_v2 = vmul.f32 %v565_v1, %v564_v0 }
 0x12c   : > { %v568_v3 = vsel %vm567_vm9, %v566_v2, 0.0 }
 0x191   : > { %v511_v26 = vpop.xlane.xlu0 %510 }
 0x192   : > { %v520_v27 = vadd.f32 %v519_v25, %v511_v26 }
 0x194   : > { %v521_v28 = vmul.f32 %v520_v27, %v871_v5 }
 0x196   : > { %529 = vperm.xlu1 %757, %v521_v28  }
 0x208   : > { %v530_v32 = vpop.permute.xlu1 %529 }
 0x209   : > { %v532_v33 = vsel %vm526_vm5, %v530_v32, 0.0 }
 0x20a   : > { %v533_v34 = vsel %vm475_vm3, %v532_v33, 0.0 }
 0x20b   : > { %v534_v35 = vrot.slane %v533_v34, 4 }
 0x20d   : > { %v535_v36 = vadd.f32 %v534_v35, %v533_v34 }
 0x20f   : > { %v536_v37 = vrot.slane %v535_v36, 2 }
 0x211   : > { %v537_v38 = vadd.f32 %v536_v37, %v535_v36 }
 0x213   : > { %v538_v40 = vrot.slane %v537_v38, 1 }
 0x215   : > { %v539_v41 = vadd.f32 %v538_v40, %v537_v38 }
 0x217   : > { %v540_v42 = vmul.f32 %v539_v41, %v435_v39 }
 0x219   : > { %v541_v43 = vsel %vm475_vm3, %v540_v42, 0.0 }
 0x21a   : > { %542 = vadd.xlane.f32.xlu2 %v541_v43 }
 0x28d   : > { %v543_v57 = vpop.xlane.xlu2 %542 }
 0x28e   : > { %v544_v58 = vmul.f32 %v543_v57, %v871_v5 }
 0x290   : > { %v549_v60 = vadd.f32 %v762_v54, %v544_v58 }
 0x292   : > { %v575_v62 = vsel %vm574_vm7, %v549_v60, -1e+30 }
 0x293   : > { %v577_v63 = vsel %vm576_vm8, %v575_v62, -inf }
 0x294   : > { %578 = vmax.xlane.f32.xlu2 %v577_v63 }
 0x29c   : > { %569 = vadd.xlane.f32.xlu2 %v568_v3 }
 0x307   : > { %v579_v4 = vpop.xlane.xlu2 %578 }
 0x308   : > { %v580_v5 = vrot.slane %v579_v4, 4 }
 0x30a   : > { %v581_v6 = vmax.f32 %v579_v4, %v580_v5 }
 0x30c   : > { %v582_v7 = vrot.slane %v581_v6, 2 }
 0x30e   : > { %v583_v8 = vmax.f32 %v581_v6, %v582_v7 }
 0x30f   : > { %v570_v12 = vpop.xlane.xlu2 %569 }
 0x310   : > { %v584_v9 = vrot.slane %v583_v8, 1  ;;  %v572_v13 = vadd.f32 %v571_v11, %v570_v12 }
 0x312   : > { %v585_v10 = vmax.f32 %v583_v8, %v584_v9 }
 0x314   : > { %742 = vpush %v585_v10 }
 0x345   : > { %s743_s30 = spop %742 }
 0x346   : > { %v587_v14 = vstv %s743_s30 }
 0x347   : > { %v588_v15 = vmax.f32 %v587_v14, %v572_v13 }
 0x349   : > { %v589_v16 = vperm.slane %v588_v15, 1  ;;  %v594_v29 = vsub.f32 %v572_v13, %v588_v15 }
 0x34b   : > { %v590_v17 = vsub.f32 %v575_v62, %v589_v16  ;;  %v595_v32 = vmul.f32 1.442695, %v594_v29 }
 0x34d   : > { %v591_v18 = vmul.f32 1.442695, %v590_v17 }
 0x34f   : > { %765 = vpow2.f32 %v591_v18 }
 0x350   : > { %767 = vpow2.f32 %v595_v32 }
 0x355   : > { %v766_v19 = vpop.eup %765 }
 0x356   : > { %v593_v20 = vsel %vm574_vm7, %v766_v19, 0.0  ;;  %v768_v33 = vpop.eup %767 }
 0x357   : > { %v597_v21 = vsel %vm576_vm8, %v593_v20, 0.0 }
 0x358   : > { %598 = vadd.xlane.f32.xlu2 %v597_v21 }
 0x3cb   : > { %v599_v22 = vpop.xlane.xlu2 %598 }
 0x3cc   : > { %v600_v23 = vrot.slane %v599_v22, 4 }
 0x3ce   : > { %v601_v24 = vadd.f32 %v600_v23, %v599_v22 }
 0x3d0   : > { %v602_v25 = vrot.slane %v601_v24, 2 }
 0x3d2   : > { %v603_v26 = vadd.f32 %v602_v25, %v601_v24 }
 0x3d4   : > { %v604_v27 = vrot.slane %v603_v26, 1 }
 0x3d6   : > { %v605_v28 = vadd.f32 %v604_v27, %v603_v26 }
 0x3d8   : > { %744 = vpush %v605_v28 }
 0x409   : > { %s745_s12 = spop %744 }
 0x40a   : > { %v607_v34 = vstv %s745_s12 }
 0x40b   : > { %v608_v35 = vadd.f32 %v768_v33, %v607_v34 }
 0x40d   : > { %769 = vrcp.f32 %v608_v35 }
 0x413   : > { %v770_v36 = vpop.eup %769 }
 0x414   : > { %v612_v37 = vmul.f32 %v770_v36, %v768_v33  ;;  %v610_v38 = vperm.slane %v770_v36, 1 }
 0x416   : > { %628 = vperm.xlu1 %757, %v612_v37   ;;  %v611_v39 = vmul.f32 %v610_v38, %v593_v20 }
 0x418   : > { %615 = vperm.xlu2 %758, %v611_v39  }
 0x41e   : > { %636 = vperm.xlu1 %757, %v572_v13  }
 0x472   : > { %v616_v40 = vpop.permute.xlu2 %615 }
 0x473   : > { %v618_v41 = vsel %vm526_vm5, %v616_v40, 0.0 }
 0x474   : > { %v619_v42 = vrot.slane %v618_v41, 4 }
 0x476   : > { %v620_v43 = vadd.f32 %v619_v42, %v618_v41 }
 0x478   : > { %v621_v44 = vrot.slane %v620_v43, 2 }
 0x47a   : > { %v622_v45 = vadd.f32 %v621_v44, %v620_v43 }
 0x47c   : > { %v623_v47 = vrot.slane %v622_v45, 1 }
 0x47e   : > { %v624_v49 = vadd.f32 %v623_v47, %v622_v45 }
 0x488   : > { %v629_v46 = vpop.permute.xlu1 %628 }
 0x489   : > { %v631_v48 = vsel %vm625_vm10, %v629_v46, 0.0 }
 0x48a   : > { %v632_v52 = vadd.f32 %v631_v48, %v624_v49 }
 0x490   : > { %v637_v50 = vpop.permute.xlu1 %636 }
 0x491   : > { %v639_v51 = vsel %vm633_vm11, %v637_v50, 0.0 }
 0x492   : > { %v641_v53 = vrot.slane %v639_v51, 7 }
 0x494   : > { %v643_v31 = vadd.f32 %v641_v53, %v632_v52 }
 0x496   : > { %644 = vst [vmem:[%s432_s15 - $0x1] sm:$0x2] %v643_v31 }
 0x497 PF: > { %s23_s19 = sadd.s32 1, %s777_s19  }
 0x498   : > { %p20_p4 = scmp.ge.s32.totalorder %s23_s19, 6  }
 0x49a   :  { %22 = sbr.rel (!%p20_p4) target bundleno = 3 (0x3), region = 103 }

</bundles_post_ra>
